<compile_context>
chip_gen: v5e
topology: v5e:2x2
jax: 0.10.0
libtpu: 0.0.40
codegen_flags: <defaults>
</compile_context>

<pallas_src>
import functools
import numpy as np
import jax
import jax.numpy as jnp
from jax.experimental import pallas as pl
from jax.experimental.pallas import tpu as pltpu

# ---------------- graph / model constants (from the module) ----------------
EDGES = [(0, 2), (1, 3), (0, 4), (4, 5), (5, 7), (6, 8)]
NODES = {
    'researcher_1': 0, 'researcher_2': 1, 'area_biology': 2, 'area_chemistry': 3,
    'question_1': 4, 'competence_1': 5, 'competence_2': 6, 'product_1': 7, 'product_2': 8,
}
NUM_NODES = len(NODES)          # 9
IN_CHANNELS = 16                # x = torch.rand((num_nodes, 16))
HIDDEN_CHANNELS = 32            # hidden_channels for GraphConv
NUM_SELECTED = 8                # columns kept by each SelectionMatrix
MACRO_LEVELS = {
    'Pesquisa':        ['P001', 'P002', 'P003'],
    'Desenvolvimento': ['P004', 'P005', 'P006'],
    'Inovacao':        ['P007', 'P008', 'P009'],
}
PROCESS_IDS = [p for procs in MACRO_LEVELS.values() for p in procs]  # P001..P009
NUM_LEVELS = len(MACRO_LEVELS)      # 3
NUM_PROCESSES = len(PROCESS_IDS)    # 9
LANE_PAD = 128                      # padded lane width for folded weights / output


# ---------------- Pallas kernel (single invocation = whole forward) ----------------
def _value_chain_kernel(a_ref, x_ref, wr_ref, wt_ref, b_ref, o_ref):
    """Whole ValueChainGNN forward in one invocation (no grid, no pipeline).

    a_ref  : (N, N)        dense adjacency (A[dst, src] = 1)
    x_ref  : (N, C)        node features
    wr_ref : (C, LANE_PAD) folded lin_rel weights  (W_rel_l^T @ S_p per process, lane-padded)
    wt_ref : (C, LANE_PAD) folded lin_root weights (W_root_l^T @ S_p per process, lane-padded)
    b_ref  : (1, LANE_PAD) folded bias             (b_l @ S_p per process, lane-padded)
    o_ref  : (N, LANE_PAD) output slab; columns p*K:(p+1)*K are process p's result
    """
    x = x_ref[...]                                                     # (N, C)
    # neighborhood sum-aggregation (messages flow src -> dst) -- computed once
    aggr = jnp.dot(a_ref[...], x, preferred_element_type=jnp.float32)  # (N, C)
    # two accumulating MXU dots -- no lane concat, no intermediate relayout
    o_ref[...] = (jnp.dot(aggr, wr_ref[...], preferred_element_type=jnp.float32)
                  + jnp.dot(x, wt_ref[...], preferred_element_type=jnp.float32)
                  + b_ref[...])                                        # (N, LANE_PAD)


# ---------------- host-side constant folding (numpy, done ONCE at build time) ----
def fold_params(w_rel, w_root, bias, S, lane_pad=LANE_PAD):
    """Fold per-level GraphConv weights/bias and one-hot selection matrices into
    two (C, lane_pad) weights and one (1, lane_pad) bias (lane-padded with zeros).

    out[:, p*K:(p+1)*K] = aggr @ (W_rel_l^T S_p) + x @ (W_root_l^T S_p) + (b_l S_p),
    with l = p // 3.
    """
    w_rel = np.asarray(w_rel, np.float32)
    w_root = np.asarray(w_root, np.float32)
    bias = np.asarray(bias, np.float32)
    S = np.asarray(S, np.float32)
    L, H, C = w_rel.shape
    P, _, K = S.shape
    lvl = np.arange(P) // (P // L)                                      # process -> level
    w_rel_f = np.einsum('phc,phk->cpk', w_rel[lvl], S).reshape(C, P * K)
    w_root_f = np.einsum('phc,phk->cpk', w_root[lvl], S).reshape(C, P * K)
    b_f = np.einsum('ph,phk->pk', bias[lvl], S).reshape(1, P * K)
    pad = lane_pad - P * K
    w_rel_f = np.pad(w_rel_f, ((0, 0), (0, pad)))
    w_root_f = np.pad(w_root_f, ((0, 0), (0, pad)))
    b_f = np.pad(b_f, ((0, 0), (0, pad)))
    return jnp.asarray(w_rel_f), jnp.asarray(w_root_f), jnp.asarray(b_f)


# ---------------- forward (jitted: pallas_call + fused epilogue) ----------------
@jax.jit
def value_chain_forward(x, adj, w_rel_f, w_root_f, b_f):
    """Runs the whole model (all 3 levels, all 9 processes) in ONE pallas_call.

    x        : (N, C)
    adj      : (N, N)
    w_rel_f  : (C, LANE_PAD)  folded + padded lin_rel weights
    w_root_f : (C, LANE_PAD)  folded + padded lin_root weights
    b_f      : (1, LANE_PAD)  folded + padded bias
    returns  : (P, N, K)
    """
    N, C = x.shape
    P, K = NUM_PROCESSES, NUM_SELECTED

    flops = 2 * (N * N * C + 2 * N * C * LANE_PAD)
    bytes_accessed = 4 * (N * N + N * C + 2 * C * LANE_PAD + LANE_PAD + N * LANE_PAD)

    vmem_spec = pl.BlockSpec(memory_space=pltpu.MemorySpace.VMEM)
    out_pad = pl.pallas_call(
        _value_chain_kernel,
        out_shape=jax.ShapeDtypeStruct((N, LANE_PAD), jnp.float32),
        in_specs=[vmem_spec] * 5,
        out_specs=vmem_spec,
        cost_estimate=pl.CostEstimate(
            flops=flops, transcendentals=0, bytes_accessed=bytes_accessed),
    )(adj, x, w_rel_f, w_root_f, b_f)

    # (N, LANE_PAD) slab -> drop padding -> (P, N, K) per-process results (fused under jit)
    out = out_pad[:, :P * K]
    return out.reshape(N, P, K).transpose(1, 0, 2)


# ---------------- parameter construction (deterministic) ----------------
def make_params(key):
    kr, kt, kb = jax.random.split(key, 3)
    L, H, C, P, K = NUM_LEVELS, HIDDEN_CHANNELS, IN_CHANNELS, NUM_PROCESSES, NUM_SELECTED
    # GraphConv weights per macro level (torch Linear convention: (out, in))
    bound = 1.0 / np.sqrt(C)
    w_rel = jax.random.uniform(kr, (L, H, C), jnp.float32, -bound, bound)
    w_root = jax.random.uniform(kt, (L, H, C), jnp.float32, -bound, bound)
    bias = jax.random.uniform(kb, (L, H), jnp.float32, -bound, bound)
    # SelectionMatrix per process: (H, K) one-hot column selectors (deterministic)
    S_np = np.zeros((P, H, K), np.float32)
    for p in range(P):
        for k in range(K):
            S_np[p, (p * K + k) % H, k] = 1.0
    S = jnp.asarray(S_np)
    return w_rel, w_root, bias, S


def build_adjacency():
    # edge_index[0]=src, edge_index[1]=dst; aggregation at node i sums over incoming edges
    A = np.zeros((NUM_NODES, NUM_NODES), np.float32)
    for src, dst in EDGES:
        A[dst, src] += 1.0
    return jnp.asarray(A)


# ---------------- pure-JAX reference for verification ----------------
def reference_forward(x, adj, w_rel, w_root, bias, S):
    outs = []
    for p in range(NUM_PROCESSES):
        lvl = p // 3
        aggr = adj @ x
        x_conv = aggr @ w_rel[lvl].T + x @ w_root[lvl].T + bias[lvl][None, :]
        outs.append(x_conv @ S[p])
    return jnp.stack(outs, axis=0)


if __name__ == "__main__":
    key = jax.random.PRNGKey(0)
    kx, kp = jax.random.split(key)

    x = jax.random.uniform(kx, (NUM_NODES, IN_CHANNELS), jnp.float32)   # torch.rand analogue
    adj = build_adjacency()
    w_rel, w_root, bias, S = make_params(kp)

    # constant folding done ONCE at build time (numpy), not per forward call
    w_rel_f, w_root_f, b_f = fold_params(w_rel, w_root, bias, S)

    out = value_chain_forward(x, adj, w_rel_f, w_root_f, b_f)
    out = jax.block_until_ready(out)

    # dict keyed by process id, matching the module's `results` structure
    results = {pid: out[i] for i, pid in enumerate(PROCESS_IDS)}

    ref = reference_forward(x, adj, w_rel, w_root, bias, S)
    assert out.shape == (NUM_PROCESSES, NUM_NODES, NUM_SELECTED)
    np.testing.assert_allclose(np.asarray(out), np.asarray(ref), rtol=1e-5, atol=1e-5)

    print("KERNEL_OK")
</pallas_src>

<mosaic_0001>
module attributes {stable_mosaic.version = 11 : i64} {
  func.func @_value_chain_kernel(%arg0: memref<9x9xf32, #tpu.memory_space<vmem>>, %arg1: memref<9x16xf32, #tpu.memory_space<vmem>>, %arg2: memref<16x128xf32, #tpu.memory_space<vmem>>, %arg3: memref<16x128xf32, #tpu.memory_space<vmem>>, %arg4: memref<1x128xf32, #tpu.memory_space<vmem>>, %arg5: memref<9x128xf32, #tpu.memory_space<vmem>>) attributes {dimension_semantics = [], scalar_prefetch = 0 : i64, scratch_operands = 0 : i64, tpu.core_type = #tpu.core_type<tc>} {
    %c0 = arith.constant 0 : index
    %c0_0 = arith.constant 0 : index
    %0 = vector.load %arg1[%c0, %c0_0] : memref<9x16xf32, #tpu.memory_space<vmem>>, vector<9x16xf32>
    %c0_1 = arith.constant 0 : index
    %c0_2 = arith.constant 0 : index
    %1 = vector.load %arg0[%c0_1, %c0_2] : memref<9x9xf32, #tpu.memory_space<vmem>>, vector<9x9xf32>
    %cst = arith.constant dense<0.000000e+00> : vector<9x16xf32>
    %2 = tpu.matmul %1, %0, %cst {dimension_numbers = #tpu.dot_dimension_numbers<[1], [0], [0], [1], [0, 0, 1, 1], [], []>} : vector<9x9xf32>, vector<9x16xf32>, vector<9x16xf32> -> vector<9x16xf32>
    %c0_3 = arith.constant 0 : index
    %c0_4 = arith.constant 0 : index
    %3 = vector.load %arg2[%c0_3, %c0_4] : memref<16x128xf32, #tpu.memory_space<vmem>>, vector<16x128xf32>
    %cst_5 = arith.constant dense<0.000000e+00> : vector<9x128xf32>
    %4 = tpu.matmul %2, %3, %cst_5 {dimension_numbers = #tpu.dot_dimension_numbers<[1], [0], [0], [1], [0, 0, 1, 1], [], []>} : vector<9x16xf32>, vector<16x128xf32>, vector<9x128xf32> -> vector<9x128xf32>
    %c0_6 = arith.constant 0 : index
    %c0_7 = arith.constant 0 : index
    %5 = vector.load %arg3[%c0_6, %c0_7] : memref<16x128xf32, #tpu.memory_space<vmem>>, vector<16x128xf32>
    %cst_8 = arith.constant dense<0.000000e+00> : vector<9x128xf32>
    %6 = tpu.matmul %0, %5, %cst_8 {dimension_numbers = #tpu.dot_dimension_numbers<[1], [0], [0], [1], [0, 0, 1, 1], [], []>} : vector<9x16xf32>, vector<16x128xf32>, vector<9x128xf32> -> vector<9x128xf32>
    %7 = arith.addf %4, %6 : vector<9x128xf32>
    %c0_9 = arith.constant 0 : index
    %c0_10 = arith.constant 0 : index
    %8 = vector.load %arg4[%c0_9, %c0_10] : memref<1x128xf32, #tpu.memory_space<vmem>>, vector<1x128xf32>
    %9 = vector.broadcast %8 : vector<1x128xf32> to vector<9x128xf32>
    %10 = arith.addf %7, %9 : vector<9x128xf32>
    %c0_11 = arith.constant 0 : index
    %c0_12 = arith.constant 0 : index
    %11 = vector.load %arg5[%c0_11, %c0_12] : memref<9x128xf32, #tpu.memory_space<vmem>>, vector<9x128xf32>
    tpu.vector_store %arg5[%c0_11, %c0_12], %10 {strides = array<i32>} : memref<9x128xf32, #tpu.memory_space<vmem>>, vector<9x128xf32>,
    return
  }
}

</mosaic_0001>

<bundles_post_ra>
// kernel: value_chain_forward.1
= control target key start
LH: loop header
LB: loop body
LE: loop exit
PB: predicated region body
PF: predicated region fallthrough
CT: control target
= control target key end

     0   :  { %10 = vsyncpa [#allocation3], 0  ;;  %s373_s0 = inlined_call_operand.hbm [shape: f32[9,9], index: 0, kind: input, shape index: {}]   ;;  %s374_s1 = inlined_call_operand.hbm [shape: f32[9,16], index: 1, kind: input, shape index: {}]   ;;  %s375_s2 = inlined_call_operand.hbm [shape: f32[16,128], index: 2, kind: input, shape index: {}]   ;;  %s376_s3 = inlined_call_operand.hbm [shape: f32[16,128], index: 3, kind: input, shape index: {}]   ;;  %s377_s4 = inlined_call_operand.vmem [shape: f32[1,128], index: 4, kind: input, shape index: {}]   ;;  %s378_s5 = inlined_call_operand.vmem [shape: f32[9,128], index: 5, kind: output, shape index: {}]  }
   0x1   :  { %11 = vsyncpa [#allocation5], 0 }
   0x2   :  { %12 = vsyncpa [#allocation8], 0  ;;  %s30_s20 = sshll.u32 %s374_s1, 4  ;;  %s316_s21 = smov [#allocation4]   ;;  %s31_s20 = int_to_ptr.hbm [resolvable:$true] %s30_s20 }
   0x3   :  { %s32_s22 = sshll.u32 %s316_s21, 4  ;;  %s17_s25 = sshll.u32 %s373_s0, 4  ;;  %s33_s22 = int_to_ptr.vmem [resolvable:$true] %s32_s22  ;;  %s18_s25 = int_to_ptr.hbm [resolvable:$true] %s17_s25 }
   0x4   :  { %s317_s26 = smov 128   ;;  %s318_s27 = smov 8  }
   0x5   :  { %38 = dma.hbm_to_vmem [thread:$0]  %s31_s20, 256, %s33_s22, [#allocation5], %s317_s26, %s317_s26, %s318_s27  }
   0x6   :  { %s319_s28 = smov [#allocation2]   ;;  %s43_s7 = sshll.u32 %s375_s2, 4  ;;  %s44_s7 = int_to_ptr.hbm [resolvable:$true] %s43_s7 }
   0x7   :  { %s19_s29 = sshll.u32 %s319_s28, 4  ;;  %s56_s9 = sshll.u32 %s376_s3, 4  ;;  %s20_s29 = int_to_ptr.vmem [resolvable:$true] %s19_s29  ;;  %s57_s9 = int_to_ptr.hbm [resolvable:$true] %s56_s9 }
   0x8   :  { %25 = dma.hbm_to_vmem [thread:$0]  %s18_s25, 256, %s20_s29, [#allocation3], %s317_s26, %s317_s26, %s318_s27  }
   0x9   :  { %s320_s10 = smov [#allocation6]   ;;  %s321_s0 = smov [#allocation7]  }
   0xa   :  { %s45_s11 = sshll.u32 %s320_s10, 4  ;;  %s58_s12 = sshll.u32 %s321_s0, 4  ;;  %s46_s11 = int_to_ptr.vmem [resolvable:$true] %s45_s11  ;;  %s59_s12 = int_to_ptr.vmem [resolvable:$true] %s58_s12 }
   0xb   :  { %51 = dma.hbm_to_vmem [thread:$0]  %s44_s7, 256, %s46_s11, [#allocation5], %s317_s26, %s317_s26, %s318_s27  }
   0xc   :  { %64 = dma.hbm_to_vmem [thread:$0]  %s57_s9, 256, %s59_s12, [#allocation8], %s317_s26, %s317_s26, %s318_s27  }
   0xd   :  { %310 = dma.done.wait [#allocation3], 256  }
   0xe   :  { %311 = vsyncadd [#allocation3], 4294967040 }
   0xf   :  { %312 = dma.done.wait [#allocation5], 512  }
  0x10   :  { %313 = vsyncadd [#allocation5], 4294966784 }
  0x11   :  { %314 = dma.done.wait [#allocation8], 256  }
  0x12   :  { %315 = vsyncadd [#allocation8], 4294967040  ;;  %vm94_vm0 = vcmask 1040384   ;;  %v84_v0 = vld [vmem:[#allocation4 + $0x8] sm:$0x1]  ;;  %v83_v1 = vld [vmem:[#allocation4] sm:$0xff] }
  0x13   :  { %v85_v2 = vld [vmem:[#allocation2] sm:$0xff]  ;;  %198 = vmatpush.msk.msra.mxu0 %vm94_vm0, %v84_v0  ;;  %205 = vmatpush.msk.msra.mxu3 %vm94_vm0, %v84_v0  ;;  %vm87_vm1 = vcmask 72704   ;;  %v86_v3 = vld [vmem:[#allocation2 + $0x8] sm:$0x1]  ;;  %v124_v6 = vld [vmem:[#allocation7 + $0x8] sm:$0xff]  ;;  %vm125_vm2 = vcmask 130048  }
  0x14   :  { %v122_v4 = vld [vmem:[#allocation6 + $0x8] sm:$0xff]  ;;  %v121_v5 = vld [vmem:[#allocation6] sm:$0xff]  ;;  %v123_v7 = vld [vmem:[#allocation7] sm:$0xff]  ;;  %145 = vmatpush.msra.mxu1 %v124_v6 }
  0x15   :  { %174 = vmatpush.msra.mxu2 %v122_v4  ;;  %113 = vmatpush.msra.mxu0 %v83_v1  ;;  %v213_v11 = vld [vmem:[%s377_s4] ss:$0 sm:$0xff] }
  0x16   :  { %206 = vmatpush.msra.mxu3 %v83_v1  ;;  %199 = vmatmul.msk.f32.vlgmr.msra.gmra.mxu0 %vm87_vm1, %v85_v2 }
  0x17   :  { %200 = vmatmul.msk.f32.vlgmr.msra.gmra.mxu3 %vm87_vm1, %v86_v3  ;;  %175 = vmatpush.msra.mxu2 %v121_v5 }
  0x18   :  { %146 = vmatpush.msra.mxu1 %v123_v7 }
  0x19   :  { %201 = vmatmul.msk.f32.vlgmr.msra.gmra.mxu1 %vm125_vm2, %v83_v1 }
  0x21   :  { %202 = vmatmul.msk.f32.gmra.mxu1 %vm125_vm2, %v84_v0 }
  0x93   :  { %v115_v8 = vpop.f32.mrf.mxu0 }
  0x94   :  { %203 = vmatmul.msk.f32.vlgmr.msra.gmra.mxu2 %vm125_vm2, %v115_v8 }
  0x96   :  { %v148_v10 = vpop.f32.mrf.mxu1 }
  0x9a   :  { %v118_v9 = vpop.f32.mrf.mxu3 }
  0x9c   :  { %204 = vmatmul.msk.f32.gmra.mxu2 %vm125_vm2, %v118_v9 }
  0x9e   :  { %v151_v15 = vpop.f32.mrf.mxu1 }
 0x117   :  { %v177_v12 = vpop.f32.mrf.mxu2 }
 0x118   :  { %v178_v13 = vadd.f32 %v177_v12, %v148_v10 }
 0x11a   :  { %v187_v14 = vadd.f32 %v213_v11, %v178_v13 }
 0x11c   :  { %189 = vst [vmem:[%s378_s5] sm:$0xff] %v187_v14 }
 0x11f   :  { %v180_v16 = vpop.f32.mrf.mxu2 }
 0x120   :  { %v181_v17 = vadd.f32 %v180_v16, %v151_v15 }
 0x122   :  { %v188_v18 = vadd.f32 %v213_v11, %v181_v17 }
 0x124   :  { %190 = vst [vmem:[%s378_s5 + $0x8] sm:$0x1] %v188_v18 }
 0x125   :  { %195 = vsyncpa [#allocation3], 1 }
 0x126   :  { %196 = vsyncpa [#allocation5], 1 }
 0x127   :  { %197 = vsyncpa [#allocation8], 1 }

</bundles_post_ra>
